<compile_context>
chip_gen: v7x
topology: tpu7x:2x2x1
jax: 0.10.0
libtpu: 0.0.40
codegen_flags: <defaults>
</compile_context>

<pallas_src>
import jax
import jax.numpy as jnp
import numpy as np
from jax.experimental import pallas as pl
from jax.experimental.pallas import tpu as pltpu

_X_MIN, _X_MAX = -0.55, 2.05
_Y_MIN, _Y_MAX = 0.503, 1.953
_LANE_ALIGN = 128


# -----------------------------------------------------------------------------
# Fused Pallas kernel: both heads + constrained output layer in one invocation
# -----------------------------------------------------------------------------
def _fused_mlp_kernel(in01_ref, x_ref, w_ref, b_ref, out1_ref, out2_ref):
    """
    in01_ref : SMEM (2,)                       f32  gates for ConstrainedOutputLayer
    x_ref    : VMEM (batch, num_i)             f32  unpadded shared input
    w_ref    : VMEM (2, n_layers, lane, lane)  bf16 padded weights (in, out) per head
    b_ref    : VMEM (2, b_rows, lane)          f32  padded biases per head
    out1_ref : VMEM (1, lane)                  f32  lanes 0..2 = [yaw, x, y]
    out2_ref : VMEM (batch, lane)              f32  head-2 output (lane padded)
    """
    n_heads, n_layers, lane, _ = w_ref.shape
    batch, num_i = x_ref.shape

    xb = x_ref[...].astype(jnp.bfloat16)                      # (batch, num_i)

    # ---- Layer 0 for both heads (contract only over the true num_i rows). ----
    acts = []
    for h in range(n_heads):
        w0 = w_ref[h, 0][:num_i, :]                           # (num_i, lane) bf16
        b0 = b_ref[h, pl.ds(0, 1), :]                         # (1, lane)     f32
        a = jnp.dot(xb, w0, preferred_element_type=jnp.float32) + b0
        acts.append(jnp.maximum(a, 0.0))

    # ---- Hidden layers 1..n-2: two independent chains, interleaved for ILP. ----
    for i in range(1, n_layers - 1):
        for h in range(n_heads):
            w = w_ref[h, i]                                   # (lane, lane) bf16
            b = b_ref[h, pl.ds(i, 1), :]                      # (1, lane)    f32
            a = jnp.dot(acts[h].astype(jnp.bfloat16), w,
                        preferred_element_type=jnp.float32) + b
            acts[h] = jnp.maximum(a, 0.0)

    li = n_layers - 1

    # ---- Head 1 final layer (no ReLU): full-batch lane-dense output. ----
    out2_ref[...] = jnp.dot(acts[1].astype(jnp.bfloat16), w_ref[1, li],
                            preferred_element_type=jnp.float32) \
                    + b_ref[1, pl.ds(li, 1), :]

    # ---- Head 0: fold the (linear) batch mean through the last layer, then run
    #      the ConstrainedOutputLayer lane-locally (rolls + VPU selects). ----
    m = jnp.mean(acts[0], axis=0, keepdims=True)              # (1, lane) true batch mean
    raw = jnp.dot(m.astype(jnp.bfloat16), w_ref[0, li],
                  preferred_element_type=jnp.float32) \
          + b_ref[0, pl.ds(li, 1), :]                         # (1, lane)
    # raw lanes: [x_off_raw, y_off_raw, x_free, y_free, yaw, ...]

    # Scalar gates straight from SMEM (stay on the scalar unit).
    c_xy = jnp.where(in01_ref[0] >= 0.5, 1.0, 0.0)
    c_rl = jnp.where(in01_ref[1] >= 0.5, 1.0, 0.0)

    lane_idx = jax.lax.broadcasted_iota(jnp.int32, (1, lane), 1)

    exp_raw = jnp.exp(raw)                                    # EUP, all lanes (finite)
    off = pltpu.roll(exp_raw, shift=1, axis=1)        # lane1=exp(x_off), lane2=exp(y_off)
    free = pltpu.roll(raw, shift=lane - 1, axis=1)    # lane1=x_free,     lane2=y_free
    yawv = pltpu.roll(raw, shift=lane - 4, axis=1)    # lane0=yaw

    lo = jnp.where(lane_idx == 1, _X_MIN, jnp.where(lane_idx == 2, _Y_MIN, 0.0))
    hi = jnp.where(lane_idx == 1, _X_MAX, jnp.where(lane_idx == 2, _Y_MAX, 0.0))
    con = (lo - off) * (1.0 - c_rl) + (hi + off) * c_rl       # lane1=x_con, lane2=y_con

    g = jnp.where(lane_idx == 1, c_xy, jnp.where(lane_idx == 2, 1.0 - c_xy, 0.0))
    mix = g * con + (1.0 - g) * free                          # lane1=x, lane2=y

    out1_ref[...] = jnp.where(lane_idx == 0, yawv,
                              jnp.where(lane_idx <= 2, mix, 0.0))


# -----------------------------------------------------------------------------
# Wrapper (single grid-less pallas_call for the whole forward)
# -----------------------------------------------------------------------------
def mlp_self_forward(packed_w, packed_b, inp, input_0_1):
    batch, num_i = inp.shape
    lane = packed_w.shape[-1]

    out1_pad, out2_pad = pl.pallas_call(
        _fused_mlp_kernel,
        out_shape=(jax.ShapeDtypeStruct((1, lane), jnp.float32),
                   jax.ShapeDtypeStruct((batch, lane), jnp.float32)),
        in_specs=[
            pl.BlockSpec(memory_space=pltpu.MemorySpace.SMEM),   # input_0_1 gates
            pl.BlockSpec(memory_space=pltpu.MemorySpace.VMEM),   # shared input
            pl.BlockSpec(memory_space=pltpu.MemorySpace.VMEM),   # weight slab (2,L,128,128)
            pl.BlockSpec(memory_space=pltpu.MemorySpace.VMEM),   # bias slab   (2,8,128)
        ],
        out_specs=(pl.BlockSpec(memory_space=pltpu.MemorySpace.VMEM),
                   pl.BlockSpec(memory_space=pltpu.MemorySpace.VMEM)),
    )(input_0_1, inp, packed_w, packed_b)

    return out1_pad[0, :3], out2_pad[:, :num_i]


# -----------------------------------------------------------------------------
# Parameter construction & host-side packing into lane-aligned slabs
# -----------------------------------------------------------------------------
def init_linear(key, fan_in, fan_out):
    kw, kb = jax.random.split(key)
    bound = 1.0 / jnp.sqrt(jnp.float32(fan_in))
    w = jax.random.uniform(kw, (fan_in, fan_out), jnp.float32, -bound, bound)
    b = jax.random.uniform(kb, (fan_out,), jnp.float32, -bound, bound)
    return w, b


def init_head(key, num_i, num_h, last_out):
    dims = [num_i, num_h, 2 * num_h, 4 * num_h, 2 * num_h, num_h, last_out]
    keys = jax.random.split(key, len(dims) - 1)
    return [init_linear(k, dims[i], dims[i + 1]) for i, k in enumerate(keys)]


def _round_up(v, m):
    return ((v + m - 1) // m) * m


def pack_heads(heads):
    """Pack both heads' params into (2, L, lane, lane) bf16 + (2, b_rows, lane) f32."""
    dims = [d for params in heads for (w, _) in params for d in w.shape]
    lane = _round_up(max(dims), _LANE_ALIGN)
    n_layers = len(heads[0])
    b_rows = _round_up(n_layers, 8)
    w_slabs, b_slabs = [], []
    for params in heads:
        w_stack = []
        b_slab = jnp.zeros((b_rows, lane), jnp.float32)
        for li, (w, b) in enumerate(params):
            wp = jnp.zeros((lane, lane), jnp.float32)
            wp = wp.at[: w.shape[0], : w.shape[1]].set(w)
            w_stack.append(wp.astype(jnp.bfloat16))
            b_slab = b_slab.at[li, : b.shape[-1]].set(b.reshape(-1))
        w_slabs.append(jnp.stack(w_stack))
        b_slabs.append(b_slab)
    return jnp.stack(w_slabs), jnp.stack(b_slabs)


# -----------------------------------------------------------------------------
# Pure-JAX reference (for a correctness sanity check)
# -----------------------------------------------------------------------------
def _reference_forward(params1, params2, inp, input_0_1):
    def run_head(params, x):
        h = x
        for li, (w, b) in enumerate(params):
            h = jnp.dot(h.astype(jnp.bfloat16), w.astype(jnp.bfloat16),
                        preferred_element_type=jnp.float32) + b.reshape(1, -1)
            if li < len(params) - 1:
                h = jnp.maximum(h, 0.0)
        return h

    raw1 = jnp.mean(run_head(params1, inp), axis=0)          # (num_o,)
    gate = jnp.where(input_0_1 >= 0.5, 1.0, 0.0)
    c_xy, c_rl = gate[0], gate[1]
    x_off, y_off = jnp.exp(raw1[0]), jnp.exp(raw1[1])
    x_con = (_X_MIN - x_off) * (1 - c_rl) + (_X_MAX + x_off) * c_rl
    y_con = (_Y_MIN - y_off) * (1 - c_rl) + (_Y_MAX + y_off) * c_rl
    x = c_xy * x_con + (1 - c_xy) * raw1[2]
    y = c_xy * raw1[3] + (1 - c_xy) * y_con
    out1 = jnp.stack([raw1[4], x, y])
    out2 = run_head(params2, inp)
    return out1, out2


# -----------------------------------------------------------------------------
if __name__ == "__main__":
    num_i, num_h, num_o = 8, 32, 5      # num_o must be 5 for the constrained layer
    batch = 8

    root = jax.random.PRNGKey(0)
    k1, k2, kx, kc = jax.random.split(root, 4)

    params1 = init_head(k1, num_i, num_h, num_o)   # output1_head: -> num_o
    params2 = init_head(k2, num_i, num_h, num_i)   # output2_head: -> num_i
    packed_w, packed_b = pack_heads([params1, params2])

    inp = jax.random.normal(kx, (batch, num_i), jnp.float32)
    input_0_1 = jax.random.uniform(kc, (2,), jnp.float32)

    fwd = jax.jit(mlp_self_forward)
    out1, out2 = fwd(packed_w, packed_b, inp, input_0_1)
    jax.block_until_ready((out1, out2))

    assert out1.shape == (3,)
    assert out2.shape == (batch, num_i)

    ref1, ref2 = _reference_forward(params1, params2, inp, input_0_1)
    np.testing.assert_allclose(np.asarray(out1), np.asarray(ref1), rtol=5e-2, atol=5e-2)
    np.testing.assert_allclose(np.asarray(out2), np.asarray(ref2), rtol=5e-2, atol=5e-2)

    print("KERNEL_OK")
</pallas_src>

<mosaic_0001>
module attributes {stable_mosaic.version = 11 : i64} {
  func.func @_fused_mlp_kernel(%arg0: memref<2xf32, #tpu.memory_space<smem>>, %arg1: memref<8x8xf32, #tpu.memory_space<vmem>>, %arg2: memref<2x6x128x128xbf16, #tpu.memory_space<vmem>>, %arg3: memref<2x8x128xf32, #tpu.memory_space<vmem>>, %arg4: memref<1x128xf32, #tpu.memory_space<vmem>>, %arg5: memref<8x128xf32, #tpu.memory_space<vmem>>) attributes {dimension_semantics = [], scalar_prefetch = 0 : i64, scratch_operands = 0 : i64, tpu.core_type = #tpu.core_type<tc>} {
    %c0 = arith.constant 0 : index
    %c0_0 = arith.constant 0 : index
    %0 = vector.load %arg1[%c0, %c0_0] : memref<8x8xf32, #tpu.memory_space<vmem>>, vector<8x8xf32>
    %1 = arith.truncf %0 : vector<8x8xf32> to vector<8x8xbf16>
    %c0_1 = arith.constant 0 : index
    %c0_2 = arith.constant 0 : index
    %c0_3 = arith.constant 0 : index
    %c0_4 = arith.constant 0 : index
    %2 = vector.load %arg2[%c0_1, %c0_2, %c0_3, %c0_4] : memref<2x6x128x128xbf16, #tpu.memory_space<vmem>>, vector<1x1x128x128xbf16>
    %3 = vector.shape_cast %2 : vector<1x1x128x128xbf16> to vector<128x128xbf16>
    %4 = vector.extract_strided_slice %3 {offsets = [0, 0], sizes = [8, 128], strides = [1, 1]} : vector<128x128xbf16> to vector<8x128xbf16>
    %c0_5 = arith.constant 0 : index
    %c0_6 = arith.constant 0 : index
    %c0_7 = arith.constant 0 : index
    %5 = vector.load %arg3[%c0_5, %c0_6, %c0_7] : memref<2x8x128xf32, #tpu.memory_space<vmem>>, vector<1x1x128xf32>
    %6 = vector.shape_cast %5 : vector<1x1x128xf32> to vector<1x128xf32>
    %cst = arith.constant dense<0.000000e+00> : vector<8x128xf32>
    %7 = tpu.matmul %1, %4, %cst {dimension_numbers = #tpu.dot_dimension_numbers<[1], [0], [0], [1], [0, 0, 1, 1], [], []>} : vector<8x8xbf16>, vector<8x128xbf16>, vector<8x128xf32> -> vector<8x128xf32>
    %8 = vector.broadcast %6 : vector<1x128xf32> to vector<8x128xf32>
    %9 = arith.addf %7, %8 : vector<8x128xf32>
    %cst_8 = arith.constant 0.000000e+00 : f32
    %10 = vector.broadcast %cst_8 : f32 to vector<8x128xf32>
    %11 = arith.maximumf %9, %10 : vector<8x128xf32>
    %c1 = arith.constant 1 : index
    %c0_9 = arith.constant 0 : index
    %c0_10 = arith.constant 0 : index
    %c0_11 = arith.constant 0 : index
    %12 = vector.load %arg2[%c1, %c0_9, %c0_10, %c0_11] : memref<2x6x128x128xbf16, #tpu.memory_space<vmem>>, vector<1x1x128x128xbf16>
    %13 = vector.shape_cast %12 : vector<1x1x128x128xbf16> to vector<128x128xbf16>
    %14 = vector.extract_strided_slice %13 {offsets = [0, 0], sizes = [8, 128], strides = [1, 1]} : vector<128x128xbf16> to vector<8x128xbf16>
    %c1_12 = arith.constant 1 : index
    %c0_13 = arith.constant 0 : index
    %c0_14 = arith.constant 0 : index
    %15 = vector.load %arg3[%c1_12, %c0_13, %c0_14] : memref<2x8x128xf32, #tpu.memory_space<vmem>>, vector<1x1x128xf32>
    %16 = vector.shape_cast %15 : vector<1x1x128xf32> to vector<1x128xf32>
    %cst_15 = arith.constant dense<0.000000e+00> : vector<8x128xf32>
    %17 = tpu.matmul %1, %14, %cst_15 {dimension_numbers = #tpu.dot_dimension_numbers<[1], [0], [0], [1], [0, 0, 1, 1], [], []>} : vector<8x8xbf16>, vector<8x128xbf16>, vector<8x128xf32> -> vector<8x128xf32>
    %18 = vector.broadcast %16 : vector<1x128xf32> to vector<8x128xf32>
    %19 = arith.addf %17, %18 : vector<8x128xf32>
    %cst_16 = arith.constant 0.000000e+00 : f32
    %20 = vector.broadcast %cst_16 : f32 to vector<8x128xf32>
    %21 = arith.maximumf %19, %20 : vector<8x128xf32>
    %c0_17 = arith.constant 0 : index
    %c1_18 = arith.constant 1 : index
    %c0_19 = arith.constant 0 : index
    %c0_20 = arith.constant 0 : index
    %22 = vector.load %arg2[%c0_17, %c1_18, %c0_19, %c0_20] : memref<2x6x128x128xbf16, #tpu.memory_space<vmem>>, vector<1x1x128x128xbf16>
    %23 = vector.shape_cast %22 : vector<1x1x128x128xbf16> to vector<128x128xbf16>
    %c0_21 = arith.constant 0 : index
    %c1_22 = arith.constant 1 : index
    %c0_23 = arith.constant 0 : index
    %24 = vector.load %arg3[%c0_21, %c1_22, %c0_23] : memref<2x8x128xf32, #tpu.memory_space<vmem>>, vector<1x1x128xf32>
    %25 = vector.shape_cast %24 : vector<1x1x128xf32> to vector<1x128xf32>
    %26 = arith.truncf %11 : vector<8x128xf32> to vector<8x128xbf16>
    %cst_24 = arith.constant dense<0.000000e+00> : vector<8x128xf32>
    %27 = tpu.matmul %26, %23, %cst_24 {dimension_numbers = #tpu.dot_dimension_numbers<[1], [0], [0], [1], [0, 0, 1, 1], [], []>} : vector<8x128xbf16>, vector<128x128xbf16>, vector<8x128xf32> -> vector<8x128xf32>
    %28 = vector.broadcast %25 : vector<1x128xf32> to vector<8x128xf32>
    %29 = arith.addf %27, %28 : vector<8x128xf32>
    %cst_25 = arith.constant 0.000000e+00 : f32
    %30 = vector.broadcast %cst_25 : f32 to vector<8x128xf32>
    %31 = arith.maximumf %29, %30 : vector<8x128xf32>
    %c1_26 = arith.constant 1 : index
    %c1_27 = arith.constant 1 : index
    %c0_28 = arith.constant 0 : index
    %c0_29 = arith.constant 0 : index
    %32 = vector.load %arg2[%c1_26, %c1_27, %c0_28, %c0_29] : memref<2x6x128x128xbf16, #tpu.memory_space<vmem>>, vector<1x1x128x128xbf16>
    %33 = vector.shape_cast %32 : vector<1x1x128x128xbf16> to vector<128x128xbf16>
    %c1_30 = arith.constant 1 : index
    %c1_31 = arith.constant 1 : index
    %c0_32 = arith.constant 0 : index
    %34 = vector.load %arg3[%c1_30, %c1_31, %c0_32] : memref<2x8x128xf32, #tpu.memory_space<vmem>>, vector<1x1x128xf32>
    %35 = vector.shape_cast %34 : vector<1x1x128xf32> to vector<1x128xf32>
    %36 = arith.truncf %21 : vector<8x128xf32> to vector<8x128xbf16>
    %cst_33 = arith.constant dense<0.000000e+00> : vector<8x128xf32>
    %37 = tpu.matmul %36, %33, %cst_33 {dimension_numbers = #tpu.dot_dimension_numbers<[1], [0], [0], [1], [0, 0, 1, 1], [], []>} : vector<8x128xbf16>, vector<128x128xbf16>, vector<8x128xf32> -> vector<8x128xf32>
    %38 = vector.broadcast %35 : vector<1x128xf32> to vector<8x128xf32>
    %39 = arith.addf %37, %38 : vector<8x128xf32>
    %cst_34 = arith.constant 0.000000e+00 : f32
    %40 = vector.broadcast %cst_34 : f32 to vector<8x128xf32>
    %41 = arith.maximumf %39, %40 : vector<8x128xf32>
    %c0_35 = arith.constant 0 : index
    %c2 = arith.constant 2 : index
    %c0_36 = arith.constant 0 : index
    %c0_37 = arith.constant 0 : index
    %42 = vector.load %arg2[%c0_35, %c2, %c0_36, %c0_37] : memref<2x6x128x128xbf16, #tpu.memory_space<vmem>>, vector<1x1x128x128xbf16>
    %43 = vector.shape_cast %42 : vector<1x1x128x128xbf16> to vector<128x128xbf16>
    %c0_38 = arith.constant 0 : index
    %c2_39 = arith.constant 2 : index
    %c0_40 = arith.constant 0 : index
    %44 = vector.load %arg3[%c0_38, %c2_39, %c0_40] : memref<2x8x128xf32, #tpu.memory_space<vmem>>, vector<1x1x128xf32>
    %45 = vector.shape_cast %44 : vector<1x1x128xf32> to vector<1x128xf32>
    %46 = arith.truncf %31 : vector<8x128xf32> to vector<8x128xbf16>
    %cst_41 = arith.constant dense<0.000000e+00> : vector<8x128xf32>
    %47 = tpu.matmul %46, %43, %cst_41 {dimension_numbers = #tpu.dot_dimension_numbers<[1], [0], [0], [1], [0, 0, 1, 1], [], []>} : vector<8x128xbf16>, vector<128x128xbf16>, vector<8x128xf32> -> vector<8x128xf32>
    %48 = vector.broadcast %45 : vector<1x128xf32> to vector<8x128xf32>
    %49 = arith.addf %47, %48 : vector<8x128xf32>
    %cst_42 = arith.constant 0.000000e+00 : f32
    %50 = vector.broadcast %cst_42 : f32 to vector<8x128xf32>
    %51 = arith.maximumf %49, %50 : vector<8x128xf32>
    %c1_43 = arith.constant 1 : index
    %c2_44 = arith.constant 2 : index
    %c0_45 = arith.constant 0 : index
    %c0_46 = arith.constant 0 : index
    %52 = vector.load %arg2[%c1_43, %c2_44, %c0_45, %c0_46] : memref<2x6x128x128xbf16, #tpu.memory_space<vmem>>, vector<1x1x128x128xbf16>
    %53 = vector.shape_cast %52 : vector<1x1x128x128xbf16> to vector<128x128xbf16>
    %c1_47 = arith.constant 1 : index
    %c2_48 = arith.constant 2 : index
    %c0_49 = arith.constant 0 : index
    %54 = vector.load %arg3[%c1_47, %c2_48, %c0_49] : memref<2x8x128xf32, #tpu.memory_space<vmem>>, vector<1x1x128xf32>
    %55 = vector.shape_cast %54 : vector<1x1x128xf32> to vector<1x128xf32>
    %56 = arith.truncf %41 : vector<8x128xf32> to vector<8x128xbf16>
    %cst_50 = arith.constant dense<0.000000e+00> : vector<8x128xf32>
    %57 = tpu.matmul %56, %53, %cst_50 {dimension_numbers = #tpu.dot_dimension_numbers<[1], [0], [0], [1], [0, 0, 1, 1], [], []>} : vector<8x128xbf16>, vector<128x128xbf16>, vector<8x128xf32> -> vector<8x128xf32>
    %58 = vector.broadcast %55 : vector<1x128xf32> to vector<8x128xf32>
    %59 = arith.addf %57, %58 : vector<8x128xf32>
    %cst_51 = arith.constant 0.000000e+00 : f32
    %60 = vector.broadcast %cst_51 : f32 to vector<8x128xf32>
    %61 = arith.maximumf %59, %60 : vector<8x128xf32>
    %c0_52 = arith.constant 0 : index
    %c3 = arith.constant 3 : index
    %c0_53 = arith.constant 0 : index
    %c0_54 = arith.constant 0 : index
    %62 = vector.load %arg2[%c0_52, %c3, %c0_53, %c0_54] : memref<2x6x128x128xbf16, #tpu.memory_space<vmem>>, vector<1x1x128x128xbf16>
    %63 = vector.shape_cast %62 : vector<1x1x128x128xbf16> to vector<128x128xbf16>
    %c0_55 = arith.constant 0 : index
    %c3_56 = arith.constant 3 : index
    %c0_57 = arith.constant 0 : index
    %64 = vector.load %arg3[%c0_55, %c3_56, %c0_57] : memref<2x8x128xf32, #tpu.memory_space<vmem>>, vector<1x1x128xf32>
    %65 = vector.shape_cast %64 : vector<1x1x128xf32> to vector<1x128xf32>
    %66 = arith.truncf %51 : vector<8x128xf32> to vector<8x128xbf16>
    %cst_58 = arith.constant dense<0.000000e+00> : vector<8x128xf32>
    %67 = tpu.matmul %66, %63, %cst_58 {dimension_numbers = #tpu.dot_dimension_numbers<[1], [0], [0], [1], [0, 0, 1, 1], [], []>} : vector<8x128xbf16>, vector<128x128xbf16>, vector<8x128xf32> -> vector<8x128xf32>
    %68 = vector.broadcast %65 : vector<1x128xf32> to vector<8x128xf32>
    %69 = arith.addf %67, %68 : vector<8x128xf32>
    %cst_59 = arith.constant 0.000000e+00 : f32
    %70 = vector.broadcast %cst_59 : f32 to vector<8x128xf32>
    %71 = arith.maximumf %69, %70 : vector<8x128xf32>
    %c1_60 = arith.constant 1 : index
    %c3_61 = arith.constant 3 : index
    %c0_62 = arith.constant 0 : index
    %c0_63 = arith.constant 0 : index
    %72 = vector.load %arg2[%c1_60, %c3_61, %c0_62, %c0_63] : memref<2x6x128x128xbf16, #tpu.memory_space<vmem>>, vector<1x1x128x128xbf16>
    %73 = vector.shape_cast %72 : vector<1x1x128x128xbf16> to vector<128x128xbf16>
    %c1_64 = arith.constant 1 : index
    %c3_65 = arith.constant 3 : index
    %c0_66 = arith.constant 0 : index
    %74 = vector.load %arg3[%c1_64, %c3_65, %c0_66] : memref<2x8x128xf32, #tpu.memory_space<vmem>>, vector<1x1x128xf32>
    %75 = vector.shape_cast %74 : vector<1x1x128xf32> to vector<1x128xf32>
    %76 = arith.truncf %61 : vector<8x128xf32> to vector<8x128xbf16>
    %cst_67 = arith.constant dense<0.000000e+00> : vector<8x128xf32>
    %77 = tpu.matmul %76, %73, %cst_67 {dimension_numbers = #tpu.dot_dimension_numbers<[1], [0], [0], [1], [0, 0, 1, 1], [], []>} : vector<8x128xbf16>, vector<128x128xbf16>, vector<8x128xf32> -> vector<8x128xf32>
    %78 = vector.broadcast %75 : vector<1x128xf32> to vector<8x128xf32>
    %79 = arith.addf %77, %78 : vector<8x128xf32>
    %cst_68 = arith.constant 0.000000e+00 : f32
    %80 = vector.broadcast %cst_68 : f32 to vector<8x128xf32>
    %81 = arith.maximumf %79, %80 : vector<8x128xf32>
    %c0_69 = arith.constant 0 : index
    %c4 = arith.constant 4 : index
    %c0_70 = arith.constant 0 : index
    %c0_71 = arith.constant 0 : index
    %82 = vector.load %arg2[%c0_69, %c4, %c0_70, %c0_71] : memref<2x6x128x128xbf16, #tpu.memory_space<vmem>>, vector<1x1x128x128xbf16>
    %83 = vector.shape_cast %82 : vector<1x1x128x128xbf16> to vector<128x128xbf16>
    %c0_72 = arith.constant 0 : index
    %c4_73 = arith.constant 4 : index
    %c0_74 = arith.constant 0 : index
    %84 = vector.load %arg3[%c0_72, %c4_73, %c0_74] : memref<2x8x128xf32, #tpu.memory_space<vmem>>, vector<1x1x128xf32>
    %85 = vector.shape_cast %84 : vector<1x1x128xf32> to vector<1x128xf32>
    %86 = arith.truncf %71 : vector<8x128xf32> to vector<8x128xbf16>
    %cst_75 = arith.constant dense<0.000000e+00> : vector<8x128xf32>
    %87 = tpu.matmul %86, %83, %cst_75 {dimension_numbers = #tpu.dot_dimension_numbers<[1], [0], [0], [1], [0, 0, 1, 1], [], []>} : vector<8x128xbf16>, vector<128x128xbf16>, vector<8x128xf32> -> vector<8x128xf32>
    %88 = vector.broadcast %85 : vector<1x128xf32> to vector<8x128xf32>
    %89 = arith.addf %87, %88 : vector<8x128xf32>
    %cst_76 = arith.constant 0.000000e+00 : f32
    %90 = vector.broadcast %cst_76 : f32 to vector<8x128xf32>
    %91 = arith.maximumf %89, %90 : vector<8x128xf32>
    %c1_77 = arith.constant 1 : index
    %c4_78 = arith.constant 4 : index
    %c0_79 = arith.constant 0 : index
    %c0_80 = arith.constant 0 : index
    %92 = vector.load %arg2[%c1_77, %c4_78, %c0_79, %c0_80] : memref<2x6x128x128xbf16, #tpu.memory_space<vmem>>, vector<1x1x128x128xbf16>
    %93 = vector.shape_cast %92 : vector<1x1x128x128xbf16> to vector<128x128xbf16>
    %c1_81 = arith.constant 1 : index
    %c4_82 = arith.constant 4 : index
    %c0_83 = arith.constant 0 : index
    %94 = vector.load %arg3[%c1_81, %c4_82, %c0_83] : memref<2x8x128xf32, #tpu.memory_space<vmem>>, vector<1x1x128xf32>
    %95 = vector.shape_cast %94 : vector<1x1x128xf32> to vector<1x128xf32>
    %96 = arith.truncf %81 : vector<8x128xf32> to vector<8x128xbf16>
    %cst_84 = arith.constant dense<0.000000e+00> : vector<8x128xf32>
    %97 = tpu.matmul %96, %93, %cst_84 {dimension_numbers = #tpu.dot_dimension_numbers<[1], [0], [0], [1], [0, 0, 1, 1], [], []>} : vector<8x128xbf16>, vector<128x128xbf16>, vector<8x128xf32> -> vector<8x128xf32>
    %98 = vector.broadcast %95 : vector<1x128xf32> to vector<8x128xf32>
    %99 = arith.addf %97, %98 : vector<8x128xf32>
    %cst_85 = arith.constant 0.000000e+00 : f32
    %100 = vector.broadcast %cst_85 : f32 to vector<8x128xf32>
    %101 = arith.maximumf %99, %100 : vector<8x128xf32>
    %102 = arith.truncf %101 : vector<8x128xf32> to vector<8x128xbf16>
    %c1_86 = arith.constant 1 : index
    %c5 = arith.constant 5 : index
    %c0_87 = arith.constant 0 : index
    %c0_88 = arith.constant 0 : index
    %103 = vector.load %arg2[%c1_86, %c5, %c0_87, %c0_88] : memref<2x6x128x128xbf16, #tpu.memory_space<vmem>>, vector<1x1x128x128xbf16>
    %104 = vector.shape_cast %103 : vector<1x1x128x128xbf16> to vector<128x128xbf16>
    %cst_89 = arith.constant dense<0.000000e+00> : vector<8x128xf32>
    %105 = tpu.matmul %102, %104, %cst_89 {dimension_numbers = #tpu.dot_dimension_numbers<[1], [0], [0], [1], [0, 0, 1, 1], [], []>} : vector<8x128xbf16>, vector<128x128xbf16>, vector<8x128xf32> -> vector<8x128xf32>
    %c1_90 = arith.constant 1 : index
    %c5_91 = arith.constant 5 : index
    %c0_92 = arith.constant 0 : index
    %106 = vector.load %arg3[%c1_90, %c5_91, %c0_92] : memref<2x8x128xf32, #tpu.memory_space<vmem>>, vector<1x1x128xf32>
    %107 = vector.shape_cast %106 : vector<1x1x128xf32> to vector<1x128xf32>
    %108 = vector.broadcast %107 : vector<1x128xf32> to vector<8x128xf32>
    %109 = arith.addf %105, %108 : vector<8x128xf32>
    %c0_93 = arith.constant 0 : index
    %c0_94 = arith.constant 0 : index
    %110 = vector.load %arg5[%c0_93, %c0_94] : memref<8x128xf32, #tpu.memory_space<vmem>>, vector<8x128xf32>
    tpu.vector_store %arg5[%c0_93, %c0_94], %109 {strides = array<i32>} : memref<8x128xf32, #tpu.memory_space<vmem>>, vector<8x128xf32>,
    %cst_95 = arith.constant dense<0.000000e+00> : vector<128xf32>
    %111 = vector.multi_reduction <add>, %91, %cst_95 [0] : vector<8x128xf32> to vector<128xf32>
    %112 = vector.shape_cast %111 : vector<128xf32> to vector<1x128xf32>
    %cst_96 = arith.constant 8.000000e+00 : f32
    %113 = vector.broadcast %cst_96 : f32 to vector<1x128xf32>
    %114 = arith.divf %112, %113 : vector<1x128xf32>
    %115 = arith.truncf %114 : vector<1x128xf32> to vector<1x128xbf16>
    %c0_97 = arith.constant 0 : index
    %c5_98 = arith.constant 5 : index
    %c0_99 = arith.constant 0 : index
    %c0_100 = arith.constant 0 : index
    %116 = vector.load %arg2[%c0_97, %c5_98, %c0_99, %c0_100] : memref<2x6x128x128xbf16, #tpu.memory_space<vmem>>, vector<1x1x128x128xbf16>
    %117 = vector.shape_cast %116 : vector<1x1x128x128xbf16> to vector<128x128xbf16>
    %cst_101 = arith.constant dense<0.000000e+00> : vector<1x128xf32>
    %118 = tpu.matmul %115, %117, %cst_101 {dimension_numbers = #tpu.dot_dimension_numbers<[1], [0], [0], [1], [0, 0, 1, 1], [], []>} : vector<1x128xbf16>, vector<128x128xbf16>, vector<1x128xf32> -> vector<1x128xf32>
    %c0_102 = arith.constant 0 : index
    %c5_103 = arith.constant 5 : index
    %c0_104 = arith.constant 0 : index
    %119 = vector.load %arg3[%c0_102, %c5_103, %c0_104] : memref<2x8x128xf32, #tpu.memory_space<vmem>>, vector<1x1x128xf32>
    %120 = vector.shape_cast %119 : vector<1x1x128xf32> to vector<1x128xf32>
    %121 = arith.addf %118, %120 : vector<1x128xf32>
    %c0_105 = arith.constant 0 : index
    %122 = memref.load %arg0[%c0_105] : memref<2xf32, #tpu.memory_space<smem>>
    %cst_106 = arith.constant 5.000000e-01 : f32
    %123 = arith.cmpf oge, %122, %cst_106 : f32
    %cst_107 = arith.constant 1.000000e+00 : f32
    %cst_108 = arith.constant 0.000000e+00 : f32
    %124 = arith.select %123, %cst_107, %cst_108 : f32
    %c1_109 = arith.constant 1 : index
    %125 = memref.load %arg0[%c1_109] : memref<2xf32, #tpu.memory_space<smem>>
    %cst_110 = arith.constant 5.000000e-01 : f32
    %126 = arith.cmpf oge, %125, %cst_110 : f32
    %cst_111 = arith.constant 1.000000e+00 : f32
    %cst_112 = arith.constant 0.000000e+00 : f32
    %127 = arith.select %126, %cst_111, %cst_112 : f32
    %128 = tpu.iota {dimensions = array<i32: 1>} : vector<1x128xi32>
    %129 = math.exp %121 : vector<1x128xf32>
    %c1_i32 = arith.constant 1 : i32
    %130 = tpu.dynamic_rotate %129 by %c1_i32 dim 1 : vector<1x128xf32>, i32 -> vector<1x128xf32>
    %c127_i32 = arith.constant 127 : i32
    %131 = tpu.dynamic_rotate %121 by %c127_i32 dim 1 : vector<1x128xf32>, i32 -> vector<1x128xf32>
    %c124_i32 = arith.constant 124 : i32
    %132 = tpu.dynamic_rotate %121 by %c124_i32 dim 1 : vector<1x128xf32>, i32 -> vector<1x128xf32>
    %c1_i32_113 = arith.constant 1 : i32
    %133 = vector.broadcast %c1_i32_113 : i32 to vector<1x128xi32>
    %134 = arith.cmpi eq, %128, %133 : vector<1x128xi32>
    %c2_i32 = arith.constant 2 : i32
    %135 = vector.broadcast %c2_i32 : i32 to vector<1x128xi32>
    %136 = arith.cmpi eq, %128, %135 : vector<1x128xi32>
    %cst_114 = arith.constant 5.030000e-01 : f32
    %cst_115 = arith.constant 0.000000e+00 : f32
    %137 = vector.broadcast %cst_114 : f32 to vector<1x128xf32>
    %138 = vector.broadcast %cst_115 : f32 to vector<1x128xf32>
    %139 = arith.select %136, %137, %138 : vector<1x128xi1>, vector<1x128xf32>
    %cst_116 = arith.constant -5.500000e-01 : f32
    %140 = vector.broadcast %cst_116 : f32 to vector<1x128xf32>
    %141 = arith.select %134, %140, %139 : vector<1x128xi1>, vector<1x128xf32>
    %c1_i32_117 = arith.constant 1 : i32
    %142 = vector.broadcast %c1_i32_117 : i32 to vector<1x128xi32>
    %143 = arith.cmpi eq, %128, %142 : vector<1x128xi32>
    %c2_i32_118 = arith.constant 2 : i32
    %144 = vector.broadcast %c2_i32_118 : i32 to vector<1x128xi32>
    %145 = arith.cmpi eq, %128, %144 : vector<1x128xi32>
    %cst_119 = arith.constant 1.953000e+00 : f32
    %cst_120 = arith.constant 0.000000e+00 : f32
    %146 = vector.broadcast %cst_119 : f32 to vector<1x128xf32>
    %147 = vector.broadcast %cst_120 : f32 to vector<1x128xf32>
    %148 = arith.select %145, %146, %147 : vector<1x128xi1>, vector<1x128xf32>
    %cst_121 = arith.constant 2.050000e+00 : f32
    %149 = vector.broadcast %cst_121 : f32 to vector<1x128xf32>
    %150 = arith.select %143, %149, %148 : vector<1x128xi1>, vector<1x128xf32>
    %151 = arith.subf %141, %130 : vector<1x128xf32>
    %cst_122 = arith.constant 1.000000e+00 : f32
    %152 = arith.subf %cst_122, %127 : f32
    %153 = vector.broadcast %152 : f32 to vector<1x128xf32>
    %154 = arith.mulf %151, %153 : vector<1x128xf32>
    %155 = arith.addf %150, %130 : vector<1x128xf32>
    %156 = vector.broadcast %127 : f32 to vector<1x128xf32>
    %157 = arith.mulf %155, %156 : vector<1x128xf32>
    %158 = arith.addf %154, %157 : vector<1x128xf32>
    %c1_i32_123 = arith.constant 1 : i32
    %159 = vector.broadcast %c1_i32_123 : i32 to vector<1x128xi32>
    %160 = arith.cmpi eq, %128, %159 : vector<1x128xi32>
    %c2_i32_124 = arith.constant 2 : i32
    %161 = vector.broadcast %c2_i32_124 : i32 to vector<1x128xi32>
    %162 = arith.cmpi eq, %128, %161 : vector<1x128xi32>
    %cst_125 = arith.constant 1.000000e+00 : f32
    %163 = arith.subf %cst_125, %124 : f32
    %cst_126 = arith.constant 0.000000e+00 : f32
    %164 = vector.broadcast %163 : f32 to vector<1x128xf32>
    %165 = vector.broadcast %cst_126 : f32 to vector<1x128xf32>
    %166 = arith.select %162, %164, %165 : vector<1x128xi1>, vector<1x128xf32>
    %167 = vector.broadcast %124 : f32 to vector<1x128xf32>
    %168 = arith.select %160, %167, %166 : vector<1x128xi1>, vector<1x128xf32>
    %169 = arith.mulf %168, %158 : vector<1x128xf32>
    %cst_127 = arith.constant 1.000000e+00 : f32
    %170 = vector.broadcast %cst_127 : f32 to vector<1x128xf32>
    %171 = arith.subf %170, %168 : vector<1x128xf32>
    %172 = arith.mulf %171, %131 : vector<1x128xf32>
    %173 = arith.addf %169, %172 : vector<1x128xf32>
    %c0_i32 = arith.constant 0 : i32
    %174 = vector.broadcast %c0_i32 : i32 to vector<1x128xi32>
    %175 = arith.cmpi eq, %128, %174 : vector<1x128xi32>
    %c2_i32_128 = arith.constant 2 : i32
    %176 = vector.broadcast %c2_i32_128 : i32 to vector<1x128xi32>
    %177 = arith.cmpi sle, %128, %176 : vector<1x128xi32>
    %cst_129 = arith.constant 0.000000e+00 : f32
    %178 = vector.broadcast %cst_129 : f32 to vector<1x128xf32>
    %179 = arith.select %177, %173, %178 : vector<1x128xi1>, vector<1x128xf32>
    %180 = arith.select %175, %132, %179 : vector<1x128xi1>, vector<1x128xf32>
    %c0_130 = arith.constant 0 : index
    %c0_131 = arith.constant 0 : index
    %181 = vector.load %arg4[%c0_130, %c0_131] : memref<1x128xf32, #tpu.memory_space<vmem>>, vector<1x128xf32>
    tpu.vector_store %arg4[%c0_130, %c0_131], %180 {strides = array<i32>} : memref<1x128xf32, #tpu.memory_space<vmem>>, vector<1x128xf32>,
    return
  }
}

</mosaic_0001>

<bundles_post_ra>
// kernel: mlp_self_forward.1
= control target key start
LH: loop header
LB: loop body
LE: loop exit
PB: predicated region body
PF: predicated region fallthrough
CT: control target
= control target key end

     0   :  { %11 = vsyncpa [#allocation5], 0  ;;  %s2187_s0 = inlined_call_operand.vmem [shape: f32[2], index: 0, kind: input, shape index: {}]   ;;  %s2188_s1 = inlined_call_operand.hbm [shape: f32[8,8], index: 1, kind: input, shape index: {}]   ;;  %s2189_s2 = inlined_call_operand.hbm [shape: bf16[2,6,128,128], index: 2, kind: input, shape index: {}]   ;;  %s2190_s3 = inlined_call_operand.hbm [shape: f32[2,8,128], index: 3, kind: input, shape index: {}]   ;;  %s2191_s4 = inlined_call_operand.vmem [shape: f32[1,128], index: 4, kind: output, shape index: {0}]   ;;  %s2192_s5 = inlined_call_operand.hbm [shape: f32[8,128], index: 5, kind: output, shape index: {1}]  }
   0x1   :  { %12 = vsyncpa [#allocation3], 0 }
   0x2   :  { %13 = vsyncpa [#allocation8], 0 }
   0x3   :  { %14 = vsyncpa [#allocation4], 0  ;;  %s1974_s18 = smov [#allocation7]   ;;  %s21_s22 = sshll.u32 %s2187_s0, 4  ;;  %s22_s22 = int_to_ptr.vmem [resolvable:$true] %s21_s22 }
   0x4   :  { %s40_s19 = sshll.u32 %s1974_s18, 4  ;;  %s1866_s25 = scalar_lea.hbm %s2189_s2, 12288  ;;  %s41_s19 = int_to_ptr.vmem [resolvable:$true] %s40_s19 }
   0x5   :  { %p1867_p0 = scmp.ne.s32.totalorder %s2189_s2, %s1866_s25  ;;  %p1870_p1 = scmp.lt.u32.totalorder %s1866_s25, %s2189_s2 }
   0x7   :  { %p1872_p2 = pnand %p1870_p1, %p1867_p0 }
   0x9   :  { %1875 = shalt.err (!%p1872_p2)
}
   0xa   :  { %s1876_s30 = scalar_lea.vmem %s41_s19, 12288  ;;  %p1881_p4 = scmp.lt.s32.totalorder %s41_s19, %s41_s19 }
   0xb   :  { %p1877_p3 = scmp.ne.s32.totalorder %s41_s19, %s1876_s30  ;;  %p1882_p5 = scmp.lt.s32.totalorder %s1876_s30, %s1876_s30 }
   0xd   :  { %p1883_p6 = por %p1882_p5, %p1881_p4 }
   0xf   :  { %p1884_p7 = pnand %p1883_p6, %p1877_p3 }
  0x11   :  { %1887 = shalt.err (!%p1884_p7)
}
  0x12   :  { %s1975_s0 = smov 64   ;;  %s1976_s6 = smov 4  }
  0x13   :  { %46 = dma.hbm_to_vmem [thread:$0]  %s2189_s2, 12288, %s41_s19, [#allocation8], %s1975_s0, %s1975_s0, %s1976_s6  }
  0x14   :  { %s1888_s9 = scalar_lea.vmem %s22_s22, 16  ;;  %p1893_p9 = scmp.lt.s32.totalorder %s22_s22, %s22_s22 }
  0x15   :  { %p1889_p8 = scmp.ne.s32.totalorder %s22_s22, %s1888_s9  ;;  %p1894_p10 = scmp.lt.s32.totalorder %s1888_s9, %s1888_s9 }
  0x17   :  { %p1895_p11 = por %p1894_p10, %p1893_p9 }
  0x19   :  { %p1896_p12 = pnand %p1895_p11, %p1889_p8 }
  0x1b   :  { %1899 = shalt.err (!%p1896_p12)
}
  0x1c   :  { %s1977_s10 = smov [#allocation2]   ;;  %s1978_s11 = smov [#allocation6]  }
  0x1d   :  { %24 = dma.vmem_to_smem %s22_s22, 16, %s1977_s10, [#allocation5]  }
  0x1e   :  { %s31_s12 = sshll.u32 %s1978_s11, 4  ;;  %s1979_s13 = smov [#allocation9]   ;;  %s32_s12 = int_to_ptr.vmem [resolvable:$true] %s31_s12 }
  0x1f   :  { %s52_s14 = sshll.u32 %s1979_s13, 4  ;;  %s1900_s2 = scalar_lea.hbm %s2188_s1, 128  ;;  %s2033_s14 = int_to_ptr.vmem [resolvable:$true] %s52_s14 }
  0x20   :  { %p1901_p13 = scmp.ne.s32.totalorder %s2188_s1, %s1900_s2  ;;  %p1904_p0 = scmp.lt.u32.totalorder %s1900_s2, %s2188_s1 }
  0x22   :  { %p1906_p1 = pnand %p1904_p0, %p1901_p13 }
  0x24   :  { %1909 = shalt.err (!%p1906_p1)
}
  0x25   :  { %s1910_s21 = scalar_lea.vmem %s32_s12, 128  ;;  %p1915_p3 = scmp.lt.s32.totalorder %s32_s12, %s32_s12 }
  0x26   :  { %p1911_p2 = scmp.ne.s32.totalorder %s32_s12, %s1910_s21  ;;  %p1916_p4 = scmp.lt.s32.totalorder %s1910_s21, %s1910_s21 }
  0x28   :  { %p1917_p5 = por %p1916_p4, %p1915_p3 }
  0x2a   :  { %p1918_p6 = pnand %p1917_p5, %p1911_p2 }
  0x2c   :  { %1921 = shalt.err (!%p1918_p6)
}
  0x2d   :  { %34 = dma.hbm_to_vmem [thread:$0]  %s2188_s1, 128, %s32_s12, [#allocation3]  }
  0x2e   :  { %s1922_s26 = scalar_lea.hbm %s2190_s3, 256 }
  0x2f   :  { %p1923_p7 = scmp.ne.s32.totalorder %s2190_s3, %s1922_s26  ;;  %p1926_p8 = scmp.lt.u32.totalorder %s1922_s26, %s2190_s3 }
  0x31   :  { %p1928_p9 = pnand %p1926_p8, %p1923_p7 }
  0x33   :  { %1931 = shalt.err (!%p1928_p9)
}
  0x34   :  { %s1932_s0 = scalar_lea.vmem %s2033_s14, 256  ;;  %p1937_p11 = scmp.lt.s32.totalorder %s2033_s14, %s2033_s14 }
  0x35   :  { %p1933_p10 = scmp.ne.s32.totalorder %s2033_s14, %s1932_s0  ;;  %p1938_p12 = scmp.lt.s32.totalorder %s1932_s0, %s1932_s0 }
  0x37   :  { %p1939_p13 = por %p1938_p12, %p1937_p11 }
  0x39   :  { %p1940_p0 = pnand %p1939_p13, %p1933_p10 }
  0x3b   :  { %1943 = shalt.err (!%p1940_p0)
}
  0x3c   :  { %s1980_s1 = smov 128   ;;  %s1981_s6 = smov 8  }
  0x3d   :  { %58 = dma.hbm_to_vmem [thread:$0]  %s2190_s3, 256, %s2033_s14, [#allocation8], %s1980_s1, %s1980_s1, %s1981_s6  }
  0x3e   :  { %1966 = dma.done.wait [#allocation5], 16  }
  0x3f   :  { %1967 = vsyncadd [#allocation5], 4294967280 }
  0x40   :  { %1968 = dma.done.wait [#allocation3], 128  }
  0x41   :  { %1969 = vsyncadd [#allocation3], 4294967168 }
  0x42   :  { %1970 = dma.done.wait [#allocation8], 12544  }
  0x43   :  { %1971 = vsyncadd [#allocation8], 4294954752 }
  0x44   :  { %71 = sfence }
  0x45   :  { %v75_v0 = vld [vmem:[#allocation7] sm:$0xf]  ;;  %vm85_vm0 = vcmask 1043456   ;;  %v73_v1 = vld [vmem:[#allocation6] sm:$0xff]  ;;  %v1982_v2 = vmov 0.0   ;;  %vm1983_vm1 = vmmov 0  }
  0x46   :  { %1558 = vmatprep.subr.bf16.mxu0 %v1982_v2  ;;  %v87_v3 = vsel %vm85_vm0, %v75_v0, 0  ;;  %1560 = vmatprep.mubr.msk.bf16.mxu0 %vm1983_vm1, %v1982_v2  ;;  %v74_v4 = vpack.c.bf16 %v73_v1, %v73_v1  ;;  %vm81_vm2 = vcmask 64512   ;;  %v131_v5 = vld [vmem:[#allocation7 + $0x180] sm:$0xf]  ;;  %v1785_v8 = vld [vmem:[#allocation7 + $0x48] sm:$0xff]   ;;  %v1786_v9 = vld [vmem:[#allocation7 + $0x50] sm:$0xff]  }
  0x47   :  { %1559 = vmatpush3.bf16.msra.mxu0 %v87_v3  ;;  %1564 = vmatprep.subr.bf16.mxu1 %v1982_v2  ;;  %v139_v6 = vsel %vm85_vm0, %v131_v5, 0  ;;  %v1784_v7 = vld [vmem:[#allocation7 + $0x40] sm:$0xff]   ;;  %v1787_v10 = vld [vmem:[#allocation7 + $0x58] sm:$0xff]   ;;  %v1789_v12 = vld [vmem:[#allocation7 + $0x68] sm:$0xff]   ;;  %s1984_s3 = smov 124   ;;  %s1985_s9 = smov [#allocation10]  }
  0x48   :  { %1565 = vmatpush3.bf16.msra.mxu1 %v139_v6  ;;  %1566 = vmatprep.mubr.msk.bf16.mxu1 %vm1983_vm1, %v1982_v2  ;;  %v1788_v11 = vld [vmem:[#allocation7 + $0x60] sm:$0xff]   ;;  %v1790_v13 = vld [vmem:[#allocation7 + $0x70] sm:$0xff]   ;;  %v1791_v14 = vld [vmem:[#allocation7 + $0x78] sm:$0xff]   ;;  %s1357_s10 = sshll.u32 %s1985_s9, 4  ;;  %s1358_s10 = int_to_ptr.vmem [resolvable:$true] %s1357_s10 }
  0x49   :  { %1570 = vmatprep.subr.bf16.mxu0 %v1982_v2  ;;  %1590 = vmatprep.subr.bf16.mxu1 %v1982_v2  ;;  %v1792_v15 = vld [vmem:[#allocation7 + $0x1c0] sm:$0xff]   ;;  %v1793_v16 = vld [vmem:[#allocation7 + $0x1c8] sm:$0xff]   ;;  %v1794_v17 = vld [vmem:[#allocation7 + $0x1d0] sm:$0xff]   ;;  %s1944_s11 = scalar_lea.vmem %s1358_s10, 128  ;;  %p1949_p2 = scmp.lt.s32.totalorder %s1358_s10, %s1358_s10 }
  0x4a   :  { %1561 = vmatmul.mubr.msk.bf16.vlgmr.msra.gmra.mrb[0].mxu0 %vm81_vm2, %v74_v4  ;;  %v1795_v18 = vld [vmem:[#allocation7 + $0x1d8] sm:$0xff]   ;;  %v1796_v19 = vld [vmem:[#allocation7 + $0x1e0] sm:$0xff]   ;;  %v1797_v20 = vld [vmem:[#allocation7 + $0x1e8] sm:$0xff]   ;;  %p1945_p1 = scmp.ne.s32.totalorder %s1358_s10, %s1944_s11  ;;  %p1950_p3 = scmp.lt.s32.totalorder %s1944_s11, %s1944_s11 }
  0x4b   :  { %1567 = vmatmul.mubr.msk.bf16.vlgmr.msra.gmra.mrb[0].mxu1 %vm81_vm2, %v74_v4  ;;  %1571 = vmatpush3.bf16.msra.mxu0 %v1784_v7  ;;  %v1798_v21 = vld [vmem:[#allocation7 + $0x1f0] sm:$0xff]   ;;  %v1799_v22 = vld [vmem:[#allocation7 + $0x1f8] sm:$0xff]   ;;  %v1370_v23 = vld [vmem:[#allocation9] ss:$0 sm:$0xff] }
  0x4c   :  { %1572 = vmatprep.subr.bf16.mxu0 %v1982_v2  ;;  %1586 = vmatprep.mubr.msk.bf16.mxu0 %vm1983_vm1, %v1982_v2  ;;  %v1372_v24 = vld [vmem:[#allocation9 + $0x8] ss:$0 sm:$0xff]  ;;  %v1800_v37 = vld [vmem:[#allocation7 + $0x80] sm:$0xff]   ;;  %v1802_v41 = vld [vmem:[#allocation7 + $0x90] sm:$0xff]   ;;  %p1951_p4 = por %p1950_p3, %p1949_p2 }
  0x4d   :  { %1606 = vmatprep.mubr.msk.bf16.mxu1 %vm1983_vm1, %v1982_v2  ;;  %1591 = vmatpush3.bf16.msra.mxu1 %v1792_v15  ;;  %v1801_v40 = vld [vmem:[#allocation7 + $0x88] sm:$0xff]   ;;  %v1803_v42 = vld [vmem:[#allocation7 + $0x98] sm:$0xff]   ;;  %v1804_v43 = vld [vmem:[#allocation7 + $0xa0] sm:$0xff]  }
  0x4e   :  { %1592 = vmatprep.subr.bf16.mxu1 %v1982_v2  ;;  %v1805_v44 = vld [vmem:[#allocation7 + $0xa8] sm:$0xff]   ;;  %v1806_v45 = vld [vmem:[#allocation7 + $0xb0] sm:$0xff]   ;;  %v1807_v46 = vld [vmem:[#allocation7 + $0xb8] sm:$0xff]   ;;  %p1952_p5 = pnand %p1951_p4, %p1945_p1 }
  0x4f   :  { %1573 = vmatpush3.bf16.msra.mxu0 %v1785_v8  ;;  %v1808_v47 = vld [vmem:[#allocation7 + $0x200] sm:$0xff]   ;;  %v1809_v48 = vld [vmem:[#allocation7 + $0x208] sm:$0xff]   ;;  %v1810_v49 = vld [vmem:[#allocation7 + $0x210] sm:$0xff]  }
  0x50   :  { %1574 = vmatprep.subr.bf16.mxu0 %v1982_v2  ;;  %v1811_v50 = vld [vmem:[#allocation7 + $0x218] sm:$0xff]   ;;  %v1812_v51 = vld [vmem:[#allocation7 + $0x220] sm:$0xff]   ;;  %v1813_v52 = vld [vmem:[#allocation7 + $0x228] sm:$0xff]  }
  0x51   :  { %1593 = vmatpush3.bf16.msra.mxu1 %v1793_v16  ;;  %v1814_v53 = vld [vmem:[#allocation7 + $0x230] sm:$0xff]   ;;  %v1815_v54 = vld [vmem:[#allocation7 + $0x238] sm:$0xff]   ;;  %v1374_v55 = vld [vmem:[#allocation9 + $0x1] ss:$0 sm:$0xff] }
  0x52   :  { %1594 = vmatprep.subr.bf16.mxu1 %v1982_v2  ;;  %v1383_v56 = vld [vmem:[#allocation9 + $0x9] ss:$0 sm:$0xff]  ;;  %v1816_v6 = vld [vmem:[#allocation7 + $0xc0] sm:$0xff]   ;;  %v1823_v15 = vld [vmem:[#allocation7 + $0xf8] sm:$0xff]  }
  0x53   :  { %1575 = vmatpush3.bf16.msra.mxu0 %v1786_v9  ;;  %v1817_v9 = vld [vmem:[#allocation7 + $0xc8] sm:$0xff]   ;;  %v1824_v16 = vld [vmem:[#allocation7 + $0x240] sm:$0xff]  }
  0x54   :  { %1576 = vmatprep.subr.bf16.mxu0 %v1982_v2 }
  0x55   :  { %1595 = vmatpush3.bf16.msra.mxu1 %v1794_v17  ;;  %v1825_v17 = vld [vmem:[#allocation7 + $0x248] sm:$0xff]  }
  0x56   :  { %1596 = vmatprep.subr.bf16.mxu1 %v1982_v2 }
  0x57   :  { %1577 = vmatpush3.bf16.msra.mxu0 %v1787_v10  ;;  %v1818_v10 = vld [vmem:[#allocation7 + $0xd0] sm:$0xff]  }
  0x58   :  { %1578 = vmatprep.subr.bf16.mxu0 %v1982_v2 }
  0x59   :  { %1597 = vmatpush3.bf16.msra.mxu1 %v1795_v18  ;;  %v1826_v18 = vld [vmem:[#allocation7 + $0x250] sm:$0xff]  }
  0x5a   :  { %1598 = vmatprep.subr.bf16.mxu1 %v1982_v2 }
  0x5b   :  { %1579 = vmatpush3.bf16.msra.mxu0 %v1788_v11  ;;  %v1819_v11 = vld [vmem:[#allocation7 + $0xd8] sm:$0xff]  }
  0x5c   :  { %1580 = vmatprep.subr.bf16.mxu0 %v1982_v2 }
  0x5d   :  { %1599 = vmatpush3.bf16.msra.mxu1 %v1796_v19  ;;  %v1827_v19 = vld [vmem:[#allocation7 + $0x258] sm:$0xff]  }
  0x5e   :  { %1600 = vmatprep.subr.bf16.mxu1 %v1982_v2 }
  0x5f   :  { %1581 = vmatpush3.bf16.msra.mxu0 %v1789_v12  ;;  %v1820_v12 = vld [vmem:[#allocation7 + $0xe0] sm:$0xff]  }
  0x60   :  { %1582 = vmatprep.subr.bf16.mxu0 %v1982_v2 }
  0x61   :  { %1601 = vmatpush3.bf16.msra.mxu1 %v1797_v20  ;;  %v1828_v20 = vld [vmem:[#allocation7 + $0x260] sm:$0xff]  }
  0x62   :  { %1602 = vmatprep.subr.bf16.mxu1 %v1982_v2 }
  0x63   :  { %1583 = vmatpush3.bf16.msra.mxu0 %v1790_v13  ;;  %v1821_v13 = vld [vmem:[#allocation7 + $0xe8] sm:$0xff]  }
  0x64   :  { %1584 = vmatprep.subr.bf16.mxu0 %v1982_v2 }
  0x65   :  { %1603 = vmatpush3.bf16.msra.mxu1 %v1798_v21  ;;  %v1829_v21 = vld [vmem:[#allocation7 + $0x268] sm:$0xff]  }
  0x66   :  { %1604 = vmatprep.subr.bf16.mxu1 %v1982_v2 }
  0x67   :  { %1585 = vmatpush3.bf16.msra.mxu0 %v1791_v14  ;;  %v1822_v14 = vld [vmem:[#allocation7 + $0xf0] sm:$0xff]  }
  0x68   :  { %1610 = vmatprep.subr.bf16.mxu0 %v1982_v2 }
  0x69   :  { %1605 = vmatpush3.bf16.msra.mxu1 %v1799_v22  ;;  %v1830_v22 = vld [vmem:[#allocation7 + $0x270] sm:$0xff]  }
  0x6a   :  { %1630 = vmatprep.subr.bf16.mxu1 %v1982_v2 }
 0x11d   :  { %v123_v25 = vpop.f32.mrb[0].mxu0 }
 0x11e   :  { %v124_v26 = vadd.f32 %v1370_v23, %v123_v25  ;;  %v1562_v27 = vpop.f32.mrb[1].mxu0  ;;  %v175_v28 = vpop.f32.mrb[0].mxu1  ;;  %v1831_v23 = vld [vmem:[#allocation7 + $0x278] sm:$0xff]   ;;  %v1401_v25 = vld [vmem:[#allocation9 + $0xa] ss:$0 sm:$0xff] }
 0x11f   :  { %v126_v29 = vpop.f32.mrb[2].mxu0  ;;  %v176_v30 = vadd.f32 %v1372_v24, %v175_v28  ;;  %v1568_v31 = vpop.f32.mrb[1].mxu1  ;;  %v1392_v24 = vld [vmem:[#allocation9 + $0x2] ss:$0 sm:$0xff] }
 0x120   :  { %v129_v32 = vmax.f32 %v124_v26, 0.0  ;;  %v1563_v33 = vpop.f32.mrb[3].mxu0  ;;  %v178_v34 = vpop.f32.mrb[2].mxu1 }
 0x121   :  { %v181_v35 = vmax.f32 %v176_v30, 0.0  ;;  %v1569_v36 = vpop.f32.mrb[3].mxu1 }
 0x122   :  { %v200_v38 = vpack.c.bf16 %v129_v32, %v129_v32 }
 0x123   :  { %v312_v39 = vpack.c.bf16 %v181_v35, %v181_v35 }
 0x124   :  { %1587 = vmatmul.mubr.bf16.vlgmr.msra.gmra.mrb[4].mxu0 %v200_v38  ;;  %v1832_v38 = vld [vmem:[#allocation7 + $0x100] sm:$0xff]  }
 0x125   :  { %1607 = vmatmul.mubr.bf16.vlgmr.msra.gmra.mrb[4].mxu1 %v312_v39  ;;  %1611 = vmatpush3.bf16.msra.mxu0 %v1800_v37 }
 0x126   :  { %1612 = vmatprep.subr.bf16.mxu0 %v1982_v2  ;;  %1626 = vmatprep.mubr.msk.bf16.mxu0 %vm1983_vm1, %v1982_v2 }
 0x127   :  { %1646 = vmatprep.mubr.msk.bf16.mxu1 %vm1983_vm1, %v1982_v2  ;;  %1631 = vmatpush3.bf16.msra.mxu1 %v1808_v47  ;;  %v1839_v47 = vld [vmem:[#allocation7 + $0x138] sm:$0xff]  }
 0x128   :  { %1632 = vmatprep.subr.bf16.mxu1 %v1982_v2 }
 0x129   :  { %1613 = vmatpush3.bf16.msra.mxu0 %v1801_v40 }
 0x12a   :  { %1614 = vmatprep.subr.bf16.mxu0 %v1982_v2 }
 0x12b   :  { %1633 = vmatpush3.bf16.msra.mxu1 %v1809_v48  ;;  %v1840_v48 = vld [vmem:[#allocation7 + $0x280] sm:$0xff]  }
 0x12c   :  { %1634 = vmatprep.subr.bf16.mxu1 %v1982_v2 }
 0x12d   :  { %1615 = vmatpush3.bf16.msra.mxu0 %v1802_v41  ;;  %v1833_v41 = vld [vmem:[#allocation7 + $0x108] sm:$0xff]  }
 0x12e   :  { %1616 = vmatprep.subr.bf16.mxu0 %v1982_v2 }
 0x12f   :  { %1635 = vmatpush3.bf16.msra.mxu1 %v1810_v49  ;;  %v1841_v49 = vld [vmem:[#allocation7 + $0x288] sm:$0xff]  }
 0x130   :  { %1636 = vmatprep.subr.bf16.mxu1 %v1982_v2 }
 0x131   :  { %1617 = vmatpush3.bf16.msra.mxu0 %v1803_v42  ;;  %v1834_v42 = vld [vmem:[#allocation7 + $0x110] sm:$0xff]  }
 0x132   :  { %1618 = vmatprep.subr.bf16.mxu0 %v1982_v2 }
 0x133   :  { %1637 = vmatpush3.bf16.msra.mxu1 %v1811_v50  ;;  %v1842_v50 = vld [vmem:[#allocation7 + $0x290] sm:$0xff]  }
 0x134   :  { %1638 = vmatprep.subr.bf16.mxu1 %v1982_v2 }
 0x135   :  { %1619 = vmatpush3.bf16.msra.mxu0 %v1804_v43  ;;  %v1835_v43 = vld [vmem:[#allocation7 + $0x118] sm:$0xff]  }
 0x136   :  { %1620 = vmatprep.subr.bf16.mxu0 %v1982_v2 }
 0x137   :  { %1639 = vmatpush3.bf16.msra.mxu1 %v1812_v51  ;;  %v1843_v51 = vld [vmem:[#allocation7 + $0x298] sm:$0xff]  }
 0x138   :  { %1640 = vmatprep.subr.bf16.mxu1 %v1982_v2 }
 0x139   :  { %1621 = vmatpush3.bf16.msra.mxu0 %v1805_v44  ;;  %v1836_v44 = vld [vmem:[#allocation7 + $0x120] sm:$0xff]  }
 0x13a   :  { %1622 = vmatprep.subr.bf16.mxu0 %v1982_v2 }
 0x13b   :  { %1641 = vmatpush3.bf16.msra.mxu1 %v1813_v52  ;;  %v1844_v52 = vld [vmem:[#allocation7 + $0x2a0] sm:$0xff]  }
 0x13c   :  { %1642 = vmatprep.subr.bf16.mxu1 %v1982_v2 }
 0x13d   :  { %1623 = vmatpush3.bf16.msra.mxu0 %v1806_v45  ;;  %v1837_v45 = vld [vmem:[#allocation7 + $0x128] sm:$0xff]  }
 0x13e   :  { %1624 = vmatprep.subr.bf16.mxu0 %v1982_v2 }
 0x13f   :  { %1643 = vmatpush3.bf16.msra.mxu1 %v1814_v53  ;;  %v1845_v53 = vld [vmem:[#allocation7 + $0x2a8] sm:$0xff]  }
 0x140   :  { %1644 = vmatprep.subr.bf16.mxu1 %v1982_v2 }
 0x141   :  { %1625 = vmatpush3.bf16.msra.mxu0 %v1807_v46  ;;  %v1838_v46 = vld [vmem:[#allocation7 + $0x130] sm:$0xff]  }
 0x142   :  { %1650 = vmatprep.subr.bf16.mxu0 %v1982_v2 }
 0x143   :  { %1645 = vmatpush3.bf16.msra.mxu1 %v1815_v54  ;;  %v1846_v54 = vld [vmem:[#allocation7 + $0x2b0] sm:$0xff]  }
 0x144   :  { %1670 = vmatprep.subr.bf16.mxu1 %v1982_v2 }
 0x1f7   :  { %v287_v57 = vpop.f32.mrb[4].mxu0 }
 0x1f8   :  { %v288_v58 = vadd.f32 %v1374_v55, %v287_v57  ;;  %v1588_v59 = vpop.f32.mrb[5].mxu0  ;;  %v399_v60 = vpop.f32.mrb[4].mxu1  ;;  %v1847_v55 = vld [vmem:[#allocation7 + $0x2b8] sm:$0xff]   ;;  %v1419_v57 = vld [vmem:[#allocation9 + $0xb] ss:$0 sm:$0xff] }
 0x1f9   :  { %v290_v61 = vpop.f32.mrb[6].mxu0  ;;  %v400_v62 = vadd.f32 %v1383_v56, %v399_v60  ;;  %v1608_v63 = vpop.f32.mrb[5].mxu1  ;;  %v1410_v56 = vld [vmem:[#allocation9 + $0x3] ss:$0 sm:$0xff] }
 0x1fa   :  { %v293_v0 = vmax.f32 %v288_v58, 0.0  ;;  %v1589_v1 = vpop.f32.mrb[7].mxu0  ;;  %v402_v3 = vpop.f32.mrb[6].mxu1 }
 0x1fb   :  { %v405_v4 = vmax.f32 %v400_v62, 0.0  ;;  %v1609_v5 = vpop.f32.mrb[7].mxu1 }
 0x1fc   :  { %v424_v7 = vpack.c.bf16 %v293_v0, %v293_v0 }
 0x1fd   :  { %v536_v8 = vpack.c.bf16 %v405_v4, %v405_v4 }
 0x1fe   :  { %1627 = vmatmul.mubr.bf16.vlgmr.msra.gmra.mrb[8].mxu0 %v424_v7 }
 0x1ff   :  { %1647 = vmatmul.mubr.bf16.vlgmr.msra.gmra.mrb[8].mxu1 %v536_v8  ;;  %1651 = vmatpush3.bf16.msra.mxu0 %v1816_v6  ;;  %v1848_v8 = vld [vmem:[#allocation7 + $0x140] sm:$0xff]  }
 0x200   :  { %1652 = vmatprep.subr.bf16.mxu0 %v1982_v2  ;;  %1666 = vmatprep.mubr.msk.bf16.mxu0 %vm1983_vm1, %v1982_v2 }
 0x201   :  { %1686 = vmatprep.mubr.msk.bf16.mxu1 %vm1983_vm1, %v1982_v2  ;;  %1671 = vmatpush3.bf16.msra.mxu1 %v1824_v16  ;;  %v1855_v16 = vld [vmem:[#allocation7 + $0x178] sm:$0xff]  }
 0x202   :  { %1672 = vmatprep.subr.bf16.mxu1 %v1982_v2 }
 0x203   :  { %1653 = vmatpush3.bf16.msra.mxu0 %v1817_v9 }
 0x204   :  { %1654 = vmatprep.subr.bf16.mxu0 %v1982_v2 }
 0x205   :  { %1673 = vmatpush3.bf16.msra.mxu1 %v1825_v17  ;;  %v1856_v17 = vld [vmem:[#allocation7 + $0x2c0] sm:$0xff]  }
 0x206   :  { %1674 = vmatprep.subr.bf16.mxu1 %v1982_v2 }
 0x207   :  { %1655 = vmatpush3.bf16.msra.mxu0 %v1818_v10  ;;  %v1849_v10 = vld [vmem:[#allocation7 + $0x148] sm:$0xff]  }
 0x208   :  { %1656 = vmatprep.subr.bf16.mxu0 %v1982_v2 }
 0x209   :  { %1675 = vmatpush3.bf16.msra.mxu1 %v1826_v18  ;;  %v1857_v18 = vld [vmem:[#allocation7 + $0x2c8] sm:$0xff]  }
 0x20a   :  { %1676 = vmatprep.subr.bf16.mxu1 %v1982_v2 }
 0x20b   :  { %1657 = vmatpush3.bf16.msra.mxu0 %v1819_v11  ;;  %v1850_v11 = vld [vmem:[#allocation7 + $0x150] sm:$0xff]  }
 0x20c   :  { %1658 = vmatprep.subr.bf16.mxu0 %v1982_v2 }
 0x20d   :  { %1677 = vmatpush3.bf16.msra.mxu1 %v1827_v19  ;;  %v1858_v19 = vld [vmem:[#allocation7 + $0x2d0] sm:$0xff]  }
 0x20e   :  { %1678 = vmatprep.subr.bf16.mxu1 %v1982_v2 }
 0x20f   :  { %1659 = vmatpush3.bf16.msra.mxu0 %v1820_v12  ;;  %v1851_v12 = vld [vmem:[#allocation7 + $0x158] sm:$0xff]  }
 0x210   :  { %1660 = vmatprep.subr.bf16.mxu0 %v1982_v2 }
 0x211   :  { %1679 = vmatpush3.bf16.msra.mxu1 %v1828_v20  ;;  %v1859_v20 = vld [vmem:[#allocation7 + $0x2d8] sm:$0xff]  }
 0x212   :  { %1680 = vmatprep.subr.bf16.mxu1 %v1982_v2 }
 0x213   :  { %1661 = vmatpush3.bf16.msra.mxu0 %v1821_v13  ;;  %v1852_v13 = vld [vmem:[#allocation7 + $0x160] sm:$0xff]  }
 0x214   :  { %1662 = vmatprep.subr.bf16.mxu0 %v1982_v2 }
 0x215   :  { %1681 = vmatpush3.bf16.msra.mxu1 %v1829_v21  ;;  %v1860_v21 = vld [vmem:[#allocation7 + $0x2e0] sm:$0xff]  }
 0x216   :  { %1682 = vmatprep.subr.bf16.mxu1 %v1982_v2 }
 0x217   :  { %1663 = vmatpush3.bf16.msra.mxu0 %v1822_v14  ;;  %v1853_v14 = vld [vmem:[#allocation7 + $0x168] sm:$0xff]  }
 0x218   :  { %1664 = vmatprep.subr.bf16.mxu0 %v1982_v2 }
 0x219   :  { %1683 = vmatpush3.bf16.msra.mxu1 %v1830_v22  ;;  %v1861_v22 = vld [vmem:[#allocation7 + $0x2e8] sm:$0xff]  }
 0x21a   :  { %1684 = vmatprep.subr.bf16.mxu1 %v1982_v2 }
 0x21b   :  { %1665 = vmatpush3.bf16.msra.mxu0 %v1823_v15  ;;  %v1854_v15 = vld [vmem:[#allocation7 + $0x170] sm:$0xff]  }
 0x21c   :  { %1690 = vmatprep.subr.bf16.mxu0 %v1982_v2 }
 0x21d   :  { %1685 = vmatpush3.bf16.msra.mxu1 %v1831_v23  ;;  %v1862_v23 = vld [vmem:[#allocation7 + $0x2f0] sm:$0xff]  }
 0x21e   :  { %1710 = vmatprep.subr.bf16.mxu1 %v1982_v2 }
 0x2d1   :  { %v511_v26 = vpop.f32.mrb[8].mxu0 }
 0x2d2   :  { %v512_v27 = vadd.f32 %v1392_v24, %v511_v26  ;;  %v1628_v28 = vpop.f32.mrb[9].mxu0  ;;  %v623_v29 = vpop.f32.mrb[8].mxu1  ;;  %v1863_v24 = vld [vmem:[#allocation7 + $0x2f8] sm:$0xff]   ;;  %v1437_v26 = vld [vmem:[#allocation9 + $0xc] ss:$0 sm:$0xff] }
 0x2d3   :  { %v514_v30 = vpop.f32.mrb[10].mxu0  ;;  %v624_v31 = vadd.f32 %v1401_v25, %v623_v29  ;;  %v1648_v32 = vpop.f32.mrb[9].mxu1  ;;  %v1428_v25 = vld [vmem:[#allocation9 + $0x4] ss:$0 sm:$0xff] }
 0x2d4   :  { %v517_v33 = vmax.f32 %v512_v27, 0.0  ;;  %v1629_v34 = vpop.f32.mrb[11].mxu0  ;;  %v626_v35 = vpop.f32.mrb[10].mxu1 }
 0x2d5   :  { %v629_v36 = vmax.f32 %v624_v31, 0.0  ;;  %v1649_v37 = vpop.f32.mrb[11].mxu1 }
 0x2d6   :  { %v648_v39 = vpack.c.bf16 %v517_v33, %v517_v33 }
 0x2d7   :  { %v760_v40 = vpack.c.bf16 %v629_v36, %v629_v36 }
 0x2d8   :  { %1667 = vmatmul.mubr.bf16.vlgmr.msra.gmra.mrb[12].mxu0 %v648_v39 }
 0x2d9   :  { %1687 = vmatmul.mubr.bf16.vlgmr.msra.gmra.mrb[12].mxu1 %v760_v40  ;;  %1691 = vmatpush3.bf16.msra.mxu0 %v1832_v38 }
 0x2da   :  { %1692 = vmatprep.subr.bf16.mxu0 %v1982_v2  ;;  %1706 = vmatprep.mubr.msk.bf16.mxu0 %vm1983_vm1, %v1982_v2 }
 0x2db   :  { %1726 = vmatprep.mubr.msk.bf16.mxu1 %vm1983_vm1, %v1982_v2  ;;  %1711 = vmatpush3.bf16.msra.mxu1 %v1840_v48  ;;  %v1216_v48 = vld [vmem:[#allocation9 + $0x5] sm:$0x1] }
 0x2dc   :  { %1712 = vmatprep.subr.bf16.mxu1 %v1982_v2 }
 0x2dd   :  { %1693 = vmatpush3.bf16.msra.mxu0 %v1833_v41 }
 0x2de   :  { %1694 = vmatprep.subr.bf16.mxu0 %v1982_v2 }
 0x2df   :  { %1713 = vmatpush3.bf16.msra.mxu1 %v1841_v49 }
 0x2e0   :  { %1714 = vmatprep.subr.bf16.mxu1 %v1982_v2 }
 0x2e1   :  { %1695 = vmatpush3.bf16.msra.mxu0 %v1834_v42 }
 0x2e2   :  { %1696 = vmatprep.subr.bf16.mxu0 %v1982_v2 }
 0x2e3   :  { %1715 = vmatpush3.bf16.msra.mxu1 %v1842_v50 }
 0x2e4   :  { %1716 = vmatprep.subr.bf16.mxu1 %v1982_v2 }
 0x2e5   :  { %1697 = vmatpush3.bf16.msra.mxu0 %v1835_v43 }
 0x2e6   :  { %1698 = vmatprep.subr.bf16.mxu0 %v1982_v2 }
 0x2e7   :  { %1717 = vmatpush3.bf16.msra.mxu1 %v1843_v51 }
 0x2e8   :  { %1718 = vmatprep.subr.bf16.mxu1 %v1982_v2 }
 0x2e9   :  { %1699 = vmatpush3.bf16.msra.mxu0 %v1836_v44 }
 0x2ea   :  { %1700 = vmatprep.subr.bf16.mxu0 %v1982_v2 }
 0x2eb   :  { %1719 = vmatpush3.bf16.msra.mxu1 %v1844_v52 }
 0x2ec   :  { %1720 = vmatprep.subr.bf16.mxu1 %v1982_v2 }
 0x2ed   :  { %1701 = vmatpush3.bf16.msra.mxu0 %v1837_v45 }
 0x2ee   :  { %1702 = vmatprep.subr.bf16.mxu0 %v1982_v2 }
 0x2ef   :  { %1721 = vmatpush3.bf16.msra.mxu1 %v1845_v53 }
 0x2f0   :  { %1722 = vmatprep.subr.bf16.mxu1 %v1982_v2 }
 0x2f1   :  { %1703 = vmatpush3.bf16.msra.mxu0 %v1838_v46 }
 0x2f2   :  { %1704 = vmatprep.subr.bf16.mxu0 %v1982_v2 }
 0x2f3   :  { %1723 = vmatpush3.bf16.msra.mxu1 %v1846_v54 }
 0x2f4   :  { %1724 = vmatprep.subr.bf16.mxu1 %v1982_v2 }
 0x2f5   :  { %1705 = vmatpush3.bf16.msra.mxu0 %v1839_v47 }
 0x2f6   :  { %1730 = vmatprep.subr.bf16.mxu0 %v1982_v2 }
 0x2f7   :  { %1725 = vmatpush3.bf16.msra.mxu1 %v1847_v55 }
 0x2f8   :  { %1750 = vmatprep.subr.bf16.mxu1 %v1982_v2 }
 0x3ab   :  { %v735_v58 = vpop.f32.mrb[12].mxu0 }
 0x3ac   :  { %v736_v59 = vadd.f32 %v1410_v56, %v735_v58  ;;  %v1668_v60 = vpop.f32.mrb[13].mxu0  ;;  %v847_v61 = vpop.f32.mrb[12].mxu1  ;;  %v1446_v58 = vld [vmem:[#allocation9 + $0xd] ss:$0 sm:$0xff] }
 0x3ad   :  { %v738_v62 = vpop.f32.mrb[14].mxu0  ;;  %v848_v63 = vadd.f32 %v1419_v57, %v847_v61  ;;  %v1688_v0 = vpop.f32.mrb[13].mxu1 }
 0x3ae   :  { %v741_v1 = vmax.f32 %v736_v59, 0.0  ;;  %v1669_v3 = vpop.f32.mrb[15].mxu0  ;;  %v850_v4 = vpop.f32.mrb[14].mxu1 }
 0x3af   :  { %v853_v5 = vmax.f32 %v848_v63, 0.0  ;;  %v1689_v6 = vpop.f32.mrb[15].mxu1 }
 0x3b0   :  { %v872_v7 = vpack.c.bf16 %v741_v1, %v741_v1 }
 0x3b1   :  { %v984_v9 = vpack.c.bf16 %v853_v5, %v853_v5 }
 0x3b2   :  { %1707 = vmatmul.mubr.bf16.vlgmr.msra.gmra.mrb[16].mxu0 %v872_v7 }
 0x3b3   :  { %1727 = vmatmul.mubr.bf16.vlgmr.msra.gmra.mrb[16].mxu1 %v984_v9  ;;  %1746 = vmatprep.mubr.msk.bf16.mxu0 %vm1983_vm1, %v1982_v2 }
 0x3b4   :  { %1751 = vmatpush3.bf16.msra.mxu1 %v1848_v8  ;;  %1766 = vmatprep.mubr.msk.bf16.mxu1 %vm1983_vm1, %v1982_v2 }
 0x3b5   :  { %1752 = vmatprep.subr.bf16.mxu1 %v1982_v2  ;;  %1731 = vmatpush3.bf16.msra.mxu0 %v1856_v17 }
 0x3b6   :  { %1732 = vmatprep.subr.bf16.mxu0 %v1982_v2 }
 0x3b8   :  { %1753 = vmatpush3.bf16.msra.mxu1 %v1849_v10 }
 0x3b9   :  { %1754 = vmatprep.subr.bf16.mxu1 %v1982_v2  ;;  %1733 = vmatpush3.bf16.msra.mxu0 %v1857_v18 }
 0x3ba   :  { %1734 = vmatprep.subr.bf16.mxu0 %v1982_v2 }
 0x3bc   :  { %1755 = vmatpush3.bf16.msra.mxu1 %v1850_v11 }
 0x3bd   :  { %1756 = vmatprep.subr.bf16.mxu1 %v1982_v2  ;;  %1735 = vmatpush3.bf16.msra.mxu0 %v1858_v19 }
 0x3be   :  { %1736 = vmatprep.subr.bf16.mxu0 %v1982_v2 }
 0x3c0   :  { %1757 = vmatpush3.bf16.msra.mxu1 %v1851_v12 }
 0x3c1   :  { %1758 = vmatprep.subr.bf16.mxu1 %v1982_v2  ;;  %1737 = vmatpush3.bf16.msra.mxu0 %v1859_v20 }
 0x3c2   :  { %1738 = vmatprep.subr.bf16.mxu0 %v1982_v2 }
 0x3c4   :  { %1759 = vmatpush3.bf16.msra.mxu1 %v1852_v13 }
 0x3c5   :  { %1760 = vmatprep.subr.bf16.mxu1 %v1982_v2  ;;  %1739 = vmatpush3.bf16.msra.mxu0 %v1860_v21 }
 0x3c6   :  { %1740 = vmatprep.subr.bf16.mxu0 %v1982_v2 }
 0x3c8   :  { %1761 = vmatpush3.bf16.msra.mxu1 %v1853_v14 }
 0x3c9   :  { %1762 = vmatprep.subr.bf16.mxu1 %v1982_v2  ;;  %1741 = vmatpush3.bf16.msra.mxu0 %v1861_v22 }
 0x3ca   :  { %1742 = vmatprep.subr.bf16.mxu0 %v1982_v2 }
 0x3cc   :  { %1763 = vmatpush3.bf16.msra.mxu1 %v1854_v15 }
 0x3cd   :  { %1764 = vmatprep.subr.bf16.mxu1 %v1982_v2  ;;  %1743 = vmatpush3.bf16.msra.mxu0 %v1862_v23 }
 0x3ce   :  { %1744 = vmatprep.subr.bf16.mxu0 %v1982_v2 }
 0x3d0   :  { %1765 = vmatpush3.bf16.msra.mxu1 %v1855_v16 }
 0x3d1   :  { %1745 = vmatpush3.bf16.msra.mxu0 %v1863_v24 }
 0x485   :  { %v959_v27 = vpop.f32.mrb[16].mxu0 }
 0x486   :  { %v960_v28 = vadd.f32 %v1428_v25, %v959_v27  ;;  %v1708_v29 = vpop.f32.mrb[17].mxu0  ;;  %v1071_v30 = vpop.f32.mrb[16].mxu1 }
 0x487   :  { %v962_v31 = vpop.f32.mrb[18].mxu0  ;;  %v1072_v32 = vadd.f32 %v1437_v26, %v1071_v30  ;;  %v1728_v33 = vpop.f32.mrb[17].mxu1 }
 0x488   :  { %v965_v34 = vmax.f32 %v960_v28, 0.0  ;;  %v1709_v35 = vpop.f32.mrb[19].mxu0  ;;  %v1074_v36 = vpop.f32.mrb[18].mxu1 }
 0x489   :  { %v1077_v37 = vmax.f32 %v1072_v32, 0.0  ;;  %v1729_v38 = vpop.f32.mrb[19].mxu1 }
 0x48a   :  { %v1190_v39 = vrot.slane %v965_v34, 4 }
 0x48b   :  { %v1078_v40 = vpack.c.bf16 %v1077_v37, %v1077_v37 }
 0x48c   :  { %v1191_v41 = vadd.f32 %v1190_v39, %v965_v34 }
 0x48d   :  { %1747 = vmatmul.mubr.bf16.vlgmr.msra.gmra.mrb[20].mxu0 %v1078_v40 }
 0x48e   :  { %v1192_v42 = vrot.slane %v1191_v41, 2 }
 0x490   :  { %v1193_v43 = vadd.f32 %v1192_v42, %v1191_v41 }
 0x492   :  { %v1194_v44 = vrot.slane %v1193_v43, 1 }
 0x494   :  { %v1195_v45 = vadd.f32 %v1194_v44, %v1193_v43 }
 0x496   :  { %v1197_v46 = vmul.f32 0.125, %v1195_v45 }
 0x498   :  { %v1198_v47 = vpack.c.bf16 %v1197_v46, %v1197_v46 }
 0x49a   :  { %1767 = vmatmul.mubr.bf16.vlgmr.msra.gmra.mrb[20].mxu1 %v1198_v47 }
 0x560   :  { %v1183_v55 = vpop.f32.mrb[20].mxu0 }
 0x561   :  { %v1748_v56 = vpop.f32.mrb[21].mxu0  ;;  %v1184_v60 = vadd.f32 %v1446_v58, %v1183_v55 }
 0x562   :  { %v1186_v57 = vpop.f32.mrb[22].mxu0 }
 0x563   :  { %v1749_v59 = vpop.f32.mrb[23].mxu0  ;;  %1189 = vst [vmem:[#allocation10] sm:$0xff] %v1184_v60 }
 0x56d   :  { %v1299_v49 = vpop.f32.mrb[20].mxu1 }
 0x56e   :  { %v1300_v50 = vadd.f32 %v1299_v49, %v1216_v48  ;;  %v1768_v51 = vpop.f32.mrb[21].mxu1 }
 0x56f   :  { %v1302_v52 = vpop.f32.mrb[22].mxu1 }
 0x570   :  { %v1313_v53 = vmul.f32 1.442695, %v1300_v50  ;;  %1319 = vrot.lane.b32.xlu1 %v1300_v50, %s1984_s3  ;;  %v1769_v54 = vpop.f32.mrb[23].mxu1 }
 0x572   :  { %1864 = vpow2.f32 %v1313_v53 }
 0x57c   :  { %v1865_v61 = vpop.eup %1864 }
 0x57d   :  { %1955 = shalt.err (!%p1952_p5)
}
 0x57e   :  { %s1956_s14 = scalar_lea.hbm %s2192_s5, 128 }
 0x57f   :  { %p1957_p6 = scmp.ne.s32.totalorder %s2192_s5, %s1956_s14  ;;  %p1960_p7 = scmp.lt.u32.totalorder %s1956_s14, %s2192_s5 }
 0x581   :  { %p1962_p8 = pnand %p1960_p7, %p1957_p6 }
 0x583   :  { %1965 = shalt.err (!%p1962_p8)
}
 0x584   :  { %1360 = dma.vmem_to_hbm [thread:$0]  %s1358_s10, 128, %s2192_s5, [#allocation4]   ;;  %v1311_v62 = vlaneseq }
 0x585   :  { %s1986_s20 = smov 1   ;;  %s1987_s21 = smov 127  }
 0x586   :  { %1315 = vrot.lane.b32.xlu0 %v1865_v61, %s1986_s20  ;;  %s1305_s22 = sld [smem:[#allocation2]]  ;;  %s1463_s23 = sld [smem:[#allocation2 + $0x1]]  ;;  %v1312_v63 = vand.u32 127, %v1311_v62 }
 0x588   :  { %vm1322_vm3 = vcmp.eq.s32.totalorder %v1312_v63, 2  ;;  %vm1321_vm4 = vcmp.eq.s32.totalorder %v1312_v63, 1  ;;  %vm1345_vm5 = vcmp.le.s32.totalorder %v1312_v63, 2  ;;  %vm1344_vm6 = vcmp.eq.s32.totalorder %v1312_v63, 0 }
 0x589   :  { %v1323_v1 = vsel %vm1322_vm3, 0.503, %v1982_v2  ;;  %v1325_v3 = vsel %vm1322_vm3, 1.953, %v1982_v2 }
 0x58a   :  { %1317 = vrot.lane.b32.xlu0 %v1300_v50, %s1987_s21  ;;  %v1324_v6 = vsel %vm1321_vm4, -0.55, %v1323_v1  ;;  %v1326_v7 = vsel %vm1321_vm4, 2.05, %v1325_v3 }
 0x58c   :  { %p1306_p9 = scmp.ge.f32.partialorder %s1305_s22, 0.5  ;;  %p1309_p10 = scmp.ge.f32.partialorder %s1463_s23, 0.5 }
 0x58e   :  { %s1307_s24 = scalar_select %p1306_p9, 1.0, 0.0 }
 0x58f   :  { %s1310_s26 = scalar_select %p1309_p10, 1.0, 0.0 }
 0x590   :  { %s1335_s25 = ssub.f32 1.0, %s1307_s24  ;;  %v1338_v5 = vstv %s1307_s24 }
 0x591   :  { %s1328_s5 = ssub.f32 1.0, %s1310_s26  ;;  %v1332_v9 = vstv %s1310_s26 }
 0x592   :  { %v1336_v0 = vstv %s1335_s25 }
 0x593   :  { %v1337_v4 = vsel %vm1322_vm3, %v1336_v0, 0.0  ;;  %v1329_v8 = vstv %s1328_s5 }
 0x594   :  { %v1339_v11 = vsel %vm1321_vm4, %v1338_v5, %v1337_v4 }
 0x595   :  { %v1341_v16 = vsub.f32 1.0, %v1339_v11 }
 0x5e2   :  { %v1320_v21 = vpop.permute.xlu1 %1319 }
 0x5f8   :  { %v1316_v10 = vpop.permute.xlu0 %1315 }
 0x5f9   :  { %v1327_v12 = vsub.f32 %v1324_v6, %v1316_v10  ;;  %v1331_v13 = vadd.f32 %v1326_v7, %v1316_v10 }
 0x5fb   :  { %v1330_v14 = vmul.f32 %v1329_v8, %v1327_v12  ;;  %v1333_v15 = vmul.f32 %v1332_v9, %v1331_v13 }
 0x5fc   :  { %v1318_v17 = vpop.permute.xlu0 %1317 }
 0x5fd   :  { %v1334_v18 = vadd.f32 %v1333_v15, %v1330_v14  ;;  %v1342_v20 = vmul.f32 %v1341_v16, %v1318_v17 }
 0x5ff   :  { %v1340_v19 = vmul.f32 %v1339_v11, %v1334_v18 }
 0x601   :  { %v1343_v2 = vadd.f32 %v1342_v20, %v1340_v19 }
 0x603   :  { %v1346_v22 = vsel %vm1345_vm5, %v1343_v2, 0.0 }
 0x604   :  { %v1347_v23 = vsel %vm1344_vm6, %v1320_v21, %v1346_v22 }
 0x605   :  { %1348 = vst [vmem:[%s2191_s4] sm:$0x1] %v1347_v23 }
 0x606   :  { %1972 = dma.done.wait [#allocation4], 128  }
 0x607   :  { %1973 = vsyncadd [#allocation4], 4294967168 }
 0x608   :  { %1366 = vsyncpa [#allocation3], 1 }
 0x609   :  { %1367 = vsyncpa [#allocation8], 1 }
 0x60a   :  { %1368 = vsyncpa [#allocation4], 1 }
 0x60b   :  { %1369 = vsyncpa [#allocation5], 1 }

</bundles_post_ra>
